<compile_context>
chip_gen: v5e
topology: v5e:2x2
jax: 0.10.0
libtpu: 0.0.40
codegen_flags: <defaults>
</compile_context>

<pallas_src>
import jax
import jax.numpy as jnp
from jax import lax
from jax.experimental import pallas as pl
from jax.experimental.pallas import tpu as pltpu


def _mlp_kernel(x_ref, w0T_ref, b0_ref, w1T_ref, b1_ref, oT_ref):
    """One M-tile of the 2-layer MLP, computed in transposed (lane-dense) form.

    x_ref  : [TM, D]   (particles on sublanes, features on lanes)
    w0T_ref: [H, D]    b0_ref: [H, 1]
    w1T_ref: [O, H]    b1_ref: [O, 1]
    oT_ref : [O, TM]   (particles on lanes -> full-width unmasked stores)
    """
    # hT[h, m] = sum_d w0T[h, d] * x[m, d]  ==  (x @ w0)[m, h]
    hT = lax.dot_general(
        w0T_ref[...], x_ref[...],
        dimension_numbers=(((1,), (1,)), ((), ())),
        preferred_element_type=jnp.float32)                  # [H, TM], f32 acc (MXU)
    hT = jnp.maximum(hT + b0_ref[...], 0.0)                  # bias + ReLU in f32 (VPU)
    # Second layer: downcast activations to the weight dtype (bf16 on the fast
    # path) so the MXU sees a homogeneous matmul; accumulation stays f32.
    yT = jnp.dot(w1T_ref[...], hT.astype(w1T_ref.dtype),
                 preferred_element_type=jnp.float32)         # [O, TM] (MXU)
    oT_ref[...] = (yT + b1_ref[...]).astype(oT_ref.dtype)    # lane-dense store


def _round_up(a, b):
    return pl.cdiv(a, b) * b


def _choose_tm(m, compute_dtype, min_tiles=8):
    """Pick the M tile: big enough to amortize the ~0.35us per-step overhead,
    small enough that the lane-padded [TM, 128] x buffers stay well inside
    scoped VMEM, and small enough to leave >= `min_tiles` grid steps so the
    'parallel' M axis can actually be split across the two v7x TensorCores."""
    itemsize = jnp.dtype(compute_dtype).itemsize
    tm_max = 16384 if itemsize <= 2 else 8192
    m128 = _round_up(m, 128)
    return min(tm_max, max(128, _round_up(pl.cdiv(m128, min_tiles), 128)))


def particle_predictor(x, w0, b0, w1, b1, *, compute_dtype=jnp.bfloat16, tm=None):
    """x: [B, N, D]; w0: [D, H]; b0: [H]; w1: [H, O]; b1: [O] -> [B, N, O]."""
    B, N, D = x.shape
    H = w0.shape[1]
    O = w1.shape[1]
    M = B * N

    if tm is None:
        tm = _choose_tm(M, compute_dtype)
    m_pad = _round_up(M, tm)

    # Layout plumbing (cheap XLA ops, no HBM transpose of x):
    # TODO(synk): switch the last tile to a ragged block (grid = cdiv, no pad)
    # once that path is profiled; kept a divisible grid here for robustness.
    x2d = x.reshape(M, D).astype(compute_dtype)
    if m_pad != M:
        x2d = jnp.pad(x2d, ((0, m_pad - M), (0, 0)))

    w0T = w0.T.astype(compute_dtype)             # [H, D]
    w1T = w1.T.astype(compute_dtype)             # [O, H]
    b0c = b0.reshape(H, 1).astype(jnp.float32)   # epilogue stays f32
    b1c = b1.reshape(O, 1).astype(jnp.float32)

    grid = (m_pad // tm,)

    outT = pl.pallas_call(
        _mlp_kernel,
        out_shape=jax.ShapeDtypeStruct((O, m_pad), compute_dtype),
        grid=grid,
        in_specs=[
            # Streamed per-tile input straight from the natural [M, D] layout.
            pl.BlockSpec((tm, D), lambda i: (i, 0)),
            # Tiny weights / biases: constant index_map -> VMEM-resident.
            pl.BlockSpec((H, D), lambda i: (0, 0)),
            pl.BlockSpec((H, 1), lambda i: (0, 0)),
            pl.BlockSpec((O, H), lambda i: (0, 0)),
            pl.BlockSpec((O, 1), lambda i: (0, 0)),
        ],
        out_specs=pl.BlockSpec((O, tm), lambda i: (0, i)),
        compiler_params=pltpu.CompilerParams(
            # Split M tiles across TensorCores on v7x (harmless on v5e/v6e).
            dimension_semantics=("parallel",),
            # Headroom for the lane-padded [TM, 128] x double-buffers; valid
            # on all generations (v7x physical VMEM is 64 MiB).
            vmem_limit_bytes=32 * 1024 * 1024,
        ),
    )(x2d, w0T, b0c, w1T, b1c)

    # Transpose back to [M, O]; padded garbage columns are sliced off.
    # (Consumers that can take the [O, M] layout directly should, to skip this.)
    out2d = outT.T[:M].astype(x.dtype)
    return out2d.reshape(B, N, O)


def _reference(x, w0, b0, w1, b1):
    B, N, D = x.shape
    h = jnp.maximum(x.reshape(B * N, D) @ w0 + b0, 0.0)
    y = h @ w1 + b1
    return y.reshape(B, N, w1.shape[1])


if __name__ == "__main__":
    # Module config (synthetic, deterministic init — not a checkpoint).
    batch_size = 2
    n_particles = 16
    input_size = 8
    hidden_size = 32
    output_size = 4

    key = jax.random.PRNGKey(0)
    kx, k0, k1, k2, k3 = jax.random.split(key, 5)

    x = jax.random.normal(kx, (batch_size, n_particles, input_size), jnp.float32)
    # Deterministic parameter init (shapes match nn.Linear, stored [in, out]).
    w0 = jax.random.normal(k0, (input_size, hidden_size), jnp.float32) * 0.1
    b0 = jax.random.normal(k1, (hidden_size,), jnp.float32) * 0.1
    w1 = jax.random.normal(k2, (hidden_size, output_size), jnp.float32) * 0.1
    b1 = jax.random.normal(k3, (output_size,), jnp.float32) * 0.1

    ref = _reference(x, w0, b0, w1, b1)

    # Exactness check: f32 compute path vs f32 reference.
    out_f32 = jax.block_until_ready(
        particle_predictor(x, w0, b0, w1, b1, compute_dtype=jnp.float32))
    assert out_f32.shape == (batch_size, n_particles, output_size)
    assert jnp.allclose(out_f32, ref, atol=1e-5, rtol=1e-5)

    # Fast path (default): bf16 inputs/weights/stores, f32 accumulation.
    out_bf16 = jax.block_until_ready(particle_predictor(x, w0, b0, w1, b1))
    assert out_bf16.shape == (batch_size, n_particles, output_size)
    assert jnp.allclose(out_bf16, ref, atol=5e-2, rtol=5e-2)

    print("KERNEL_OK")
</pallas_src>

<mosaic_0001>
module attributes {stable_mosaic.version = 11 : i64} {
  func.func @_mlp_kernel(%arg0: i32, %arg1: memref<128x8xf32, #tpu.memory_space<vmem>>, %arg2: memref<32x8xf32, #tpu.memory_space<vmem>>, %arg3: memref<32x1xf32, #tpu.memory_space<vmem>>, %arg4: memref<4x32xf32, #tpu.memory_space<vmem>>, %arg5: memref<4x1xf32, #tpu.memory_space<vmem>>, %arg6: memref<4x128xf32, #tpu.memory_space<vmem>>) attributes {dimension_semantics = [#tpu.dimension_semantics<parallel>], iteration_bounds = array<i64: 1>, scalar_prefetch = 0 : i64, scratch_operands = 0 : i64, tpu.core_type = #tpu.core_type<tc>, window_params = [{transform_indices = @transform_0, window_bounds = array<i64: 128, 8>}, {pipeline_mode = #tpu.pipeline_mode<synchronous>, transform_indices = @transform_1, window_bounds = array<i64: 32, 8>}, {pipeline_mode = #tpu.pipeline_mode<synchronous>, transform_indices = @transform_2, window_bounds = array<i64: 32, 1>}, {pipeline_mode = #tpu.pipeline_mode<synchronous>, transform_indices = @transform_3, window_bounds = array<i64: 4, 32>}, {pipeline_mode = #tpu.pipeline_mode<synchronous>, transform_indices = @transform_4, window_bounds = array<i64: 4, 1>}, {transform_indices = @transform_5, window_bounds = array<i64: 4, 128>}]} {
    %c0 = arith.constant 0 : index
    %c0_0 = arith.constant 0 : index
    %0 = vector.load %arg2[%c0, %c0_0] : memref<32x8xf32, #tpu.memory_space<vmem>>, vector<32x8xf32>
    %c0_1 = arith.constant 0 : index
    %c0_2 = arith.constant 0 : index
    %1 = vector.load %arg1[%c0_1, %c0_2] : memref<128x8xf32, #tpu.memory_space<vmem>>, vector<128x8xf32>
    %cst = arith.constant dense<0.000000e+00> : vector<32x128xf32>
    %2 = tpu.matmul %0, %1, %cst {dimension_numbers = #tpu.dot_dimension_numbers<[1], [1], [0], [0], [0, 0, 1, 0], [], []>} : vector<32x8xf32>, vector<128x8xf32>, vector<32x128xf32> -> vector<32x128xf32>
    %c0_3 = arith.constant 0 : index
    %c0_4 = arith.constant 0 : index
    %3 = vector.load %arg3[%c0_3, %c0_4] : memref<32x1xf32, #tpu.memory_space<vmem>>, vector<32x1xf32>
    %4 = vector.broadcast %3 : vector<32x1xf32> to vector<32x128xf32>
    %5 = arith.addf %2, %4 : vector<32x128xf32>
    %cst_5 = arith.constant 0.000000e+00 : f32
    %6 = vector.broadcast %cst_5 : f32 to vector<32x128xf32>
    %7 = arith.maximumf %5, %6 : vector<32x128xf32>
    %c0_6 = arith.constant 0 : index
    %c0_7 = arith.constant 0 : index
    %8 = vector.load %arg4[%c0_6, %c0_7] : memref<4x32xf32, #tpu.memory_space<vmem>>, vector<4x32xf32>
    %cst_8 = arith.constant dense<0.000000e+00> : vector<4x128xf32>
    %9 = tpu.matmul %8, %7, %cst_8 {dimension_numbers = #tpu.dot_dimension_numbers<[1], [0], [0], [1], [0, 0, 1, 1], [], []>} : vector<4x32xf32>, vector<32x128xf32>, vector<4x128xf32> -> vector<4x128xf32>
    %c0_9 = arith.constant 0 : index
    %c0_10 = arith.constant 0 : index
    %10 = vector.load %arg5[%c0_9, %c0_10] : memref<4x1xf32, #tpu.memory_space<vmem>>, vector<4x1xf32>
    %11 = vector.broadcast %10 : vector<4x1xf32> to vector<4x128xf32>
    %12 = arith.addf %9, %11 : vector<4x128xf32>
    %c0_11 = arith.constant 0 : index
    %c0_12 = arith.constant 0 : index
    %13 = vector.load %arg6[%c0_11, %c0_12] : memref<4x128xf32, #tpu.memory_space<vmem>>, vector<4x128xf32>
    tpu.vector_store %arg6[%c0_11, %c0_12], %12 {strides = array<i32>} : memref<4x128xf32, #tpu.memory_space<vmem>>, vector<4x128xf32>,
    return
  }
  func.func @transform_0(%arg0: i32) -> (i32, i32) {
    %c0_i32 = arith.constant 0 : i32
    %c0_i32_0 = arith.constant 0 : i32
    return %arg0, %c0_i32 : i32, i32
  }
  func.func @transform_1(%arg0: i32) -> (i32, i32) {
    %c0_i32 = arith.constant 0 : i32
    %c0_i32_0 = arith.constant 0 : i32
    %c0_i32_1 = arith.constant 0 : i32
    return %c0_i32, %c0_i32_0 : i32, i32
  }
  func.func @transform_2(%arg0: i32) -> (i32, i32) {
    %c0_i32 = arith.constant 0 : i32
    %c0_i32_0 = arith.constant 0 : i32
    %c0_i32_1 = arith.constant 0 : i32
    return %c0_i32, %c0_i32_0 : i32, i32
  }
  func.func @transform_3(%arg0: i32) -> (i32, i32) {
    %c0_i32 = arith.constant 0 : i32
    %c0_i32_0 = arith.constant 0 : i32
    %c0_i32_1 = arith.constant 0 : i32
    return %c0_i32, %c0_i32_0 : i32, i32
  }
  func.func @transform_4(%arg0: i32) -> (i32, i32) {
    %c0_i32 = arith.constant 0 : i32
    %c0_i32_0 = arith.constant 0 : i32
    %c0_i32_1 = arith.constant 0 : i32
    return %c0_i32, %c0_i32_0 : i32, i32
  }
  func.func @transform_5(%arg0: i32) -> (i32, i32) {
    %c0_i32 = arith.constant 0 : i32
    %c0_i32_0 = arith.constant 0 : i32
    return %c0_i32, %arg0 : i32, i32
  }
}

</mosaic_0001>

<bundles_post_ra>
// kernel: tpu_custom_call.1
= control target key start
LH: loop header
LB: loop body
LE: loop exit
PB: predicated region body
PF: predicated region fallthrough
CT: control target
= control target key end

     0   :  { %vm65_vm0 = vcmask 64512   ;;  %s456_s0 = inlined_call_operand.vmem [shape: f32[128,8], index: 0, kind: input, shape index: {}]   ;;  %s457_s1 = inlined_call_operand.vmem [shape: f32[32,8], index: 1, kind: input, shape index: {}]   ;;  %s458_s2 = inlined_call_operand.vmem [shape: f32[32,1], index: 2, kind: input, shape index: {}]   ;;  %s459_s3 = inlined_call_operand.vmem [shape: f32[4,32], index: 3, kind: input, shape index: {}]   ;;  %s460_s4 = inlined_call_operand.vmem [shape: f32[4,1], index: 4, kind: input, shape index: {}]   ;;  %s461_s5 = inlined_call_operand.hbm [shape: f32[4,128], index: 5, kind: output, shape index: {}]  }
   0x1   :  { %v40_v0 = vld [vmem:[%s456_s0 + $0x78] sm:$0xff]  ;;  %v39_v1 = vld [vmem:[%s456_s0 + $0x70] sm:$0xff] }
   0x2   :  { %229 = vmatpush.xpose.msk.msra.mxu3 %vm65_vm0, %v40_v0  ;;  %228 = vmatpush.xpose.msk.msra.mxu2 %vm65_vm0, %v40_v0 }
   0x3   :  { %207 = vmatpush.xpose.msk.msra.mxu0 %vm65_vm0, %v40_v0 }
   0x4   :  { %10 = vsyncpa [#allocation3], 0  ;;  %v38_v2 = vld [vmem:[%s456_s0 + $0x68] sm:$0xff]  ;;  %v37_v3 = vld [vmem:[%s456_s0 + $0x60] sm:$0xff]  ;;  %v291_v10 = vmov 0   ;;  %vm166_vm1 = vcmask 261120  }
   0x5   :  { %v36_v4 = vld [vmem:[%s456_s0 + $0x58] sm:$0xff]  ;;  %v35_v5 = vld [vmem:[%s456_s0 + $0x50] sm:$0xff]  ;;  %v34_v6 = vld [vmem:[%s456_s0 + $0x48] sm:$0xff]  ;;  %262 = vset.pattern.permute.xlu0 %v291_v10  ;;  %263 = vset.pattern.permute.xlu1 %v291_v10  ;;  %s292_s16 = smov [#allocation2]   ;;  %s198_s20 = sshll.u32 %s461_s5, 4  ;;  %s199_s20 = int_to_ptr.hbm [resolvable:$true] %s198_s20 }
   0x6   :  { %231 = vmatpush.xpose.msk.msra.mxu3 %vm65_vm0, %v39_v1  ;;  %230 = vmatpush.xpose.msk.msra.mxu2 %vm65_vm0, %v39_v1  ;;  %v33_v7 = vld [vmem:[%s456_s0 + $0x40] sm:$0xff]  ;;  %v32_v8 = vld [vmem:[%s456_s0 + $0x38] sm:$0xff]  ;;  %v31_v9 = vld [vmem:[%s456_s0 + $0x30] sm:$0xff]  ;;  %s196_s17 = sshll.u32 %s292_s16, 4  ;;  %s197_s17 = int_to_ptr.vmem [resolvable:$true] %s196_s17 }
   0x7   :  { %208 = vmatpush.xpose.msk.msra.mxu0 %vm65_vm0, %v39_v1  ;;  %264 = vset.pattern.permute.xlu2 %v291_v10  ;;  %v30_v11 = vld [vmem:[%s456_s0 + $0x28] sm:$0xff]  ;;  %v44_v12 = vld [vmem:[%s458_s2 + $0x18] sm:$0xff]  ;;  %v29_v14 = vld [vmem:[%s456_s0 + $0x20] sm:$0xff] }
   0x8   :  { %v42_v13 = vld [vmem:[%s458_s2 + $0x8] sm:$0xff]  ;;  %62 = vperm.xlu0 %262, %v44_v12   ;;  %v28_v15 = vld [vmem:[%s456_s0 + $0x18] sm:$0xff]  ;;  %v43_v16 = vld [vmem:[%s458_s2 + $0x10] sm:$0xff] }
   0x9   :  { %52 = vperm.xlu1 %263, %v42_v13   ;;  %v41_v17 = vld [vmem:[%s458_s2] sm:$0xff]  ;;  %v27_v18 = vld [vmem:[%s456_s0 + $0x10] sm:$0xff]  ;;  %v26_v19 = vld [vmem:[%s456_s0 + $0x8] sm:$0xff] }
   0xa   :  { %233 = vmatpush.xpose.msk.msra.mxu3 %vm65_vm0, %v38_v2  ;;  %232 = vmatpush.xpose.msk.msra.mxu2 %vm65_vm0, %v38_v2  ;;  %v25_v20 = vld [vmem:[%s456_s0] sm:$0xff]  ;;  %v23_v21 = vld [vmem:[%s457_s1 + $0x10] sm:$0xff]  ;;  %v22_v22 = vld [vmem:[%s457_s1 + $0x8] sm:$0xff] }
   0xb   :  { %209 = vmatpush.xpose.msk.msra.mxu0 %vm65_vm0, %v38_v2  ;;  %v21_v23 = vld [vmem:[%s457_s1] sm:$0xff]  ;;  %v24_v24 = vld [vmem:[%s457_s1 + $0x18] sm:$0xff] }
   0xc   :  { %v160_v25 = vld [vmem:[%s460_s4] sm:$0xf] }
   0xd   :  { %163 = vperm.xlu2 %264, %v160_v25   ;;  %v159_v42 = vld [vmem:[%s459_s3] sm:$0xf] }
   0xe   :  { %235 = vmatpush.xpose.msk.msra.mxu3 %vm65_vm0, %v37_v3  ;;  %234 = vmatpush.xpose.msk.msra.mxu2 %vm65_vm0, %v37_v3 }
   0xf   :  { %210 = vmatpush.xpose.msk.msra.mxu0 %vm65_vm0, %v37_v3 }
  0x10   :  { %57 = vperm.xlu0 %262, %v43_v16  }
  0x11   :  { %47 = vperm.xlu1 %263, %v41_v17  }
  0x12   :  { %237 = vmatpush.xpose.msk.msra.mxu3 %vm65_vm0, %v36_v4  ;;  %236 = vmatpush.xpose.msk.msra.mxu2 %vm65_vm0, %v36_v4 }
  0x13   :  { %211 = vmatpush.xpose.msk.msra.mxu0 %vm65_vm0, %v36_v4 }
  0x16   :  { %239 = vmatpush.xpose.msk.msra.mxu3 %vm65_vm0, %v35_v5  ;;  %238 = vmatpush.xpose.msk.msra.mxu2 %vm65_vm0, %v35_v5 }
  0x17   :  { %212 = vmatpush.xpose.msk.msra.mxu0 %vm65_vm0, %v35_v5 }
  0x1a   :  { %241 = vmatpush.xpose.msk.msra.mxu3 %vm65_vm0, %v34_v6  ;;  %240 = vmatpush.xpose.msk.msra.mxu2 %vm65_vm0, %v34_v6 }
  0x1b   :  { %213 = vmatpush.xpose.msk.msra.mxu0 %vm65_vm0, %v34_v6 }
  0x1e   :  { %243 = vmatpush.xpose.msk.msra.mxu3 %vm65_vm0, %v33_v7  ;;  %242 = vmatpush.xpose.msk.msra.mxu2 %vm65_vm0, %v33_v7 }
  0x1f   :  { %214 = vmatpush.xpose.msk.msra.mxu0 %vm65_vm0, %v33_v7 }
  0x22   :  { %245 = vmatpush.xpose.msk.msra.mxu3 %vm65_vm0, %v32_v8  ;;  %244 = vmatpush.xpose.msk.msra.mxu2 %vm65_vm0, %v32_v8 }
  0x23   :  { %215 = vmatpush.xpose.msk.msra.mxu0 %vm65_vm0, %v32_v8 }
  0x26   :  { %247 = vmatpush.xpose.msk.msra.mxu3 %vm65_vm0, %v31_v9  ;;  %246 = vmatpush.xpose.msk.msra.mxu2 %vm65_vm0, %v31_v9 }
  0x27   :  { %216 = vmatpush.xpose.msk.msra.mxu0 %vm65_vm0, %v31_v9 }
  0x2a   :  { %249 = vmatpush.xpose.msk.msra.mxu3 %vm65_vm0, %v30_v11  ;;  %248 = vmatpush.xpose.msk.msra.mxu2 %vm65_vm0, %v30_v11 }
  0x2b   :  { %217 = vmatpush.xpose.msk.msra.mxu0 %vm65_vm0, %v30_v11 }
  0x2e   :  { %251 = vmatpush.xpose.msk.msra.mxu3 %vm65_vm0, %v29_v14  ;;  %250 = vmatpush.xpose.msk.msra.mxu2 %vm65_vm0, %v29_v14 }
  0x2f   :  { %218 = vmatpush.xpose.msk.msra.mxu0 %vm65_vm0, %v29_v14 }
  0x32   :  { %253 = vmatpush.xpose.msk.msra.mxu3 %vm65_vm0, %v28_v15  ;;  %252 = vmatpush.xpose.msk.msra.mxu2 %vm65_vm0, %v28_v15 }
  0x33   :  { %219 = vmatpush.xpose.msk.msra.mxu0 %vm65_vm0, %v28_v15 }
  0x36   :  { %255 = vmatpush.xpose.msk.msra.mxu3 %vm65_vm0, %v27_v18  ;;  %254 = vmatpush.xpose.msk.msra.mxu2 %vm65_vm0, %v27_v18 }
  0x37   :  { %220 = vmatpush.xpose.msk.msra.mxu0 %vm65_vm0, %v27_v18 }
  0x3a   :  { %257 = vmatpush.xpose.msk.msra.mxu3 %vm65_vm0, %v26_v19  ;;  %256 = vmatpush.xpose.msk.msra.mxu2 %vm65_vm0, %v26_v19 }
  0x3b   :  { %221 = vmatpush.xpose.msk.msra.mxu0 %vm65_vm0, %v26_v19 }
  0x3e   :  { %259 = vmatpush.xpose.msk.msra.mxu3 %vm65_vm0, %v25_v20  ;;  %258 = vmatpush.xpose.msk.msra.mxu2 %vm65_vm0, %v25_v20 }
  0x3f   :  { %222 = vmatpush.xpose.msk.msra.mxu0 %vm65_vm0, %v25_v20 }
  0x41   :  { %225 = vmatmul.msk.f32.vlgmr.msra.gmra.mxu3 %vm65_vm0, %v23_v21  ;;  %224 = vmatmul.msk.f32.vlgmr.msra.gmra.mxu2 %vm65_vm0, %v22_v22 }
  0x42   :  { %223 = vmatmul.msk.f32.vlgmr.msra.gmra.mxu0 %vm65_vm0, %v21_v23 }
  0x49   :  { %226 = vmatmul.msk.f32.gmra.mxu3 %vm65_vm0, %v24_v24 }
  0x67   :  { %v164_v43 = vpop.permute.xlu2 %163 }
  0x7a   :  { %v63_v26 = vpop.permute.xlu0 %62 }
  0x7b   :  { %v53_v27 = vpop.permute.xlu1 %52 }
  0x82   :  { %v58_v29 = vpop.permute.xlu0 %57 }
  0x83   :  { %v48_v34 = vpop.permute.xlu1 %47 }
  0xbf   :  { %v143_v35 = vpop.f32.mrf.mxu0 }
  0xc0   :  { %v144_v39 = vadd.f32 %v143_v35, %v48_v34 }
  0xc2   :  { %v155_v41 = vmax.f32 %v144_v39, 0.0 }
  0xc4   :  { %v149_v28 = vpop.f32.mrf.mxu3  ;;  %v146_v30 = vpop.f32.mrf.mxu2 }
  0xc5   :  { %v150_v32 = vadd.f32 %v149_v28, %v58_v29  ;;  %v147_v36 = vadd.f32 %v146_v30, %v53_v27 }
  0xc7   :  { %v157_v38 = vmax.f32 %v150_v32, 0.0  ;;  %v156_v40 = vmax.f32 %v147_v36, 0.0 }
  0xcc   :  { %v152_v31 = vpop.f32.mrf.mxu3 }
  0xcd   :  { %v153_v33 = vadd.f32 %v152_v31, %v63_v26 }
  0xcf   :  { %v158_v37 = vmax.f32 %v153_v33, 0.0 }
  0xd1   :  { %182 = vmatpush.msra.mxu1 %v158_v37 }
  0xd3   :  { %183 = vmatpush.msra.mxu1 %v157_v38 }
  0xd5   :  { %184 = vmatpush.msra.mxu1 %v156_v40 }
  0xd7   :  { %185 = vmatpush.msra.mxu1 %v155_v41 }
  0xd8   :  { %227 = vmatmul.msk.f32.vlgmr.msra.gmra.mxu1 %vm166_vm1, %v159_v42 }
 0x155   :  { %v187_v44 = vpop.f32.mrf.mxu1 }
 0x156   :  { %v188_v45 = vadd.f32 %v187_v44, %v164_v43 }
 0x158   :  { %190 = vst [vmem:[#allocation2] sm:$0xf] %v188_v45 }
 0x159   :  { %201 = dma.vmem_to_hbm [thread:$0]  %s197_s17, 64, %s199_s20, [#allocation3]  }
 0x15a   :  { %289 = dma.done.wait [#allocation3], 64  }
 0x15b   :  { %290 = vsyncadd [#allocation3], 4294967232 }
 0x15c   :  { %206 = vsyncpa [#allocation3], 1 }

</bundles_post_ra>
